<compile_context>
chip_gen: v6e
topology: v6e:2x2x1
jax: 0.10.0
libtpu: 0.0.40
codegen_flags: <defaults>
</compile_context>

<pallas_src>
import functools

import jax
import jax.numpy as jnp
from jax.experimental import pallas as pl
from jax.experimental.pallas import tpu as pltpu

# ---- synthetic SharedGroupMLP configuration -------------------------------
E = 32                 # embedding size
N_CAND = 8             # candidates per example (fixed to 8 by the forward)
GROUPS = 4             # number of groups along the embedding dim
GS = E // GROUPS       # per-group feature size
GIN = 2 * GS           # MLP input per group (two diff rows flattened)
HID = 32               # MLP hidden width per group
GOUT = 8               # MLP output per group
OUT = GROUPS * GOUT    # final feature size per (example, candidate)  = 32
FHID = GROUPS * HID    # fused hidden width per candidate             = 128
CAND_IN = N_CAND * E   # lane-dense candidate input width             = 256
CAND_HID = N_CAND * FHID   # fused hidden width across candidates     = 1024
CAND_OUT = N_CAND * OUT    # lane-dense output width                  = 256


def _build_fused_weights(w1, b1, w2, b2):
    """Block-diagonal fusion of the shared group MLP (built once, in JAX).

    w1: (GIN, HID)  rows [:GS] multiply the d21 chunk, [GS:] the d32 chunk.
    Returns (all weights cast to bf16, biases kept f32):
      w1c     : (E, FHID)           layer-1 weights applied to d21
      b1f     : (1, FHID)           tiled layer-1 bias (f32)
      w1d_big : (CAND_IN, CAND_HID) layer-1 weights applied to all 8 d32's
      w2_big  : (CAND_HID, CAND_OUT) layer-2 weights, candidate block-diag
      b2_big  : (1, CAND_OUT)       tiled layer-2 bias (f32)
    """
    w1c = jnp.zeros((E, FHID), jnp.float32)
    w1d = jnp.zeros((E, FHID), jnp.float32)
    w2g = jnp.zeros((FHID, OUT), jnp.float32)
    for g in range(GROUPS):
        w1c = w1c.at[g * GS:(g + 1) * GS, g * HID:(g + 1) * HID].set(w1[:GS])
        w1d = w1d.at[g * GS:(g + 1) * GS, g * HID:(g + 1) * HID].set(w1[GS:])
        w2g = w2g.at[g * HID:(g + 1) * HID, g * GOUT:(g + 1) * GOUT].set(w2)
    b1f = jnp.tile(jnp.reshape(b1, (1, HID)), (1, GROUPS))          # (1, 128)
    b2f = jnp.tile(jnp.reshape(b2, (1, GOUT)), (1, GROUPS))         # (1, 32)

    # Candidate-level block-diagonal fusion (8 candidates in one matmul).
    w1d_big = jnp.zeros((CAND_IN, CAND_HID), jnp.float32)
    w2_big = jnp.zeros((CAND_HID, CAND_OUT), jnp.float32)
    for j in range(N_CAND):
        w1d_big = w1d_big.at[j * E:(j + 1) * E,
                             j * FHID:(j + 1) * FHID].set(w1d)
        w2_big = w2_big.at[j * FHID:(j + 1) * FHID,
                           j * OUT:(j + 1) * OUT].set(w2g)
    b2_big = jnp.tile(b2f, (1, N_CAND))                             # (1, 256)

    return (w1c.astype(jnp.bfloat16), b1f,
            w1d_big.astype(jnp.bfloat16),
            w2_big.astype(jnp.bfloat16), b2_big)


def analogy_kernel(ctx_ref, cand_ref, w1c_ref, b1_ref, w1d_ref, w2_ref,
                   b2_ref, out_ref):
    """One batch tile.

    ctx_ref : (TB, 2*E)      = [ctx0 | ctx1]          lane-dense, bf16
    cand_ref: (TB, CAND_IN)  = [cand0 | ... | cand7]  lane-dense, bf16
    w1c_ref : (E, FHID) bf16          b1_ref: (1, FHID) f32
    w1d_ref : (CAND_IN, CAND_HID) bf16
    w2_ref  : (CAND_HID, CAND_OUT) bf16   b2_ref: (1, CAND_OUT) f32
    out_ref : (TB, CAND_OUT) f32                      lane-dense
    """
    ctx = ctx_ref[...]                                   # (TB, 64) bf16
    c0 = ctx[:, :E]
    c1 = ctx[:, E:]
    d21 = c1 - c0                                        # (TB, 32) bf16

    # Shared-context half of layer 1 + bias: once per example, shared by
    # all 8 candidates.
    h_ctx = jnp.dot(d21, w1c_ref[...],
                    preferred_element_type=jnp.float32) + b1_ref[...]

    # Candidate diffs for all 8 candidates at once (one 256-wide subtract).
    d32_all = cand_ref[...] - jnp.tile(c1, (1, N_CAND))  # (TB, 256) bf16

    # Layer 1 (candidate half): one block-diagonal 256->1024 matmul.
    h = jnp.dot(d32_all, w1d_ref[...],
                preferred_element_type=jnp.float32)      # (TB, 1024) f32
    h = jnp.maximum(h + jnp.tile(h_ctx, (1, N_CAND)), 0.0)

    # Layer 2: block-diagonal 1024->256 matmul -> lane-dense output slab.
    out = jnp.dot(h.astype(jnp.bfloat16), w2_ref[...],
                  preferred_element_type=jnp.float32) + b2_ref[...]
    out_ref[...] = out.astype(out_ref.dtype)


@functools.partial(jax.jit, static_argnames=("tile_b",))
def constrative_analogy_forward(listener_context, listener_candidates,
                                w1, b1, w2, b2, tile_b=1024):
    b = listener_context.shape[0]
    assert listener_context.shape[1:] == (2, E)
    assert listener_candidates.shape[1:] == (N_CAND, E)

    w1c, b1f, w1d_big, w2_big, b2_big = _build_fused_weights(w1, b1, w2, b2)

    # Lane-dense 2-D bf16 views for the DMA (half the HBM bytes); no padded
    # copy of the inputs is materialized.
    ctx2 = listener_context.reshape(b, 2 * E).astype(jnp.bfloat16)
    cand2 = listener_candidates.reshape(b, CAND_IN).astype(jnp.bfloat16)

    # Batch tile: either the full batch, or a multiple of 8; the partial last
    # block (if any) is masked by Pallas, so no jnp.pad is needed.
    tb = min(tile_b, b)
    if tb < b:
        tb = max(8, (tb // 8) * 8)
        if tb >= b:
            tb = b
    if tb == b and b >= 16:
        # Guarantee >=2 grid steps so v7x's two TensorCores both get work.
        half = ((b + 1) // 2 + 7) // 8 * 8
        if half < b:
            tb = half
    grid_b = pl.cdiv(b, tb)

    def weight_spec(shape):
        return pl.BlockSpec(shape, lambda i: (0, 0))

    out = pl.pallas_call(
        analogy_kernel,
        out_shape=jax.ShapeDtypeStruct((b, CAND_OUT), jnp.float32),
        grid=(grid_b,),
        in_specs=[
            pl.BlockSpec((tb, 2 * E), lambda i: (i, 0)),
            pl.BlockSpec((tb, CAND_IN), lambda i: (i, 0)),
            weight_spec((E, FHID)),
            weight_spec((1, FHID)),
            weight_spec((CAND_IN, CAND_HID)),
            weight_spec((CAND_HID, CAND_OUT)),
            weight_spec((1, CAND_OUT)),
        ],
        out_specs=pl.BlockSpec((tb, CAND_OUT), lambda i: (i, 0)),
        compiler_params=pltpu.CompilerParams(
            dimension_semantics=("parallel",),
            vmem_limit_bytes=32 * 1024 * 1024),
    )(ctx2, cand2, w1c, b1f, w1d_big, w2_big, b2_big)

    # analogy_embedding.view(b, n, -1)
    return out.reshape(b, N_CAND, OUT)


def reference_forward(ctx, cand, w1, b1, w2, b2):
    """Pure-JAX f32 re-implementation of the PyTorch forward (for checking)."""
    b, _, e = ctx.shape
    n = cand.shape[1]
    ctx_rep = jnp.broadcast_to(ctx[:, None, :, :], (b, n, 2, e))
    merged = jnp.concatenate([ctx_rep, cand[:, :, None, :]], axis=2)
    merged = merged.reshape(b * n, 3, e)
    d21 = merged[:, 1, :] - merged[:, 0, :]
    d32 = merged[:, 2, :] - merged[:, 1, :]
    x = jnp.stack([d21, d32], axis=1)                    # (b*n, 2, e)
    outs = []
    for g in range(GROUPS):
        xg = x[:, :, g * GS:(g + 1) * GS].reshape(b * n, GIN)
        h = jnp.maximum(xg @ w1 + b1, 0.0)
        outs.append(h @ w2 + b2)
    return jnp.concatenate(outs, axis=-1).reshape(b, n, OUT)


if __name__ == "__main__":
    key = jax.random.PRNGKey(0)
    k_ctx, k_cand, k_w1, k_w2, k_ctx2, k_cand2 = jax.random.split(key, 6)

    # Deterministic synthetic parameters for the shared group MLP.
    w1 = jax.random.normal(k_w1, (GIN, HID), jnp.float32) * 0.1
    b1 = (0.01 * jnp.arange(HID, dtype=jnp.float32)).reshape(1, HID)
    w2 = jax.random.normal(k_w2, (HID, GOUT), jnp.float32) * 0.1
    b2 = (0.01 * jnp.arange(GOUT, dtype=jnp.float32)).reshape(1, GOUT)

    # --- small case (single grid point, block == full batch) ---------------
    b = 2
    listener_context = jax.random.normal(k_ctx, (b, 2, E), jnp.float32)
    listener_candidates = jax.random.normal(k_cand, (b, N_CAND, E), jnp.float32)

    out = constrative_analogy_forward(listener_context, listener_candidates,
                                      w1, b1, w2, b2)
    out = jax.block_until_ready(out)
    ref = reference_forward(listener_context, listener_candidates,
                            w1, b1, w2, b2)
    assert out.shape == (b, N_CAND, OUT), out.shape
    # bf16 operands inside the kernel vs f32 reference -> loose tolerance.
    assert jnp.allclose(out, ref, atol=3e-2, rtol=3e-2), "mismatch (small)"

    # --- tiled case (multi-step grid with a masked partial last block) -----
    b_big = 20
    ctx_big = jax.random.normal(k_ctx2, (b_big, 2, E), jnp.float32)
    cand_big = jax.random.normal(k_cand2, (b_big, N_CAND, E), jnp.float32)
    out_big = constrative_analogy_forward(ctx_big, cand_big,
                                          w1, b1, w2, b2, tile_b=8)
    out_big = jax.block_until_ready(out_big)
    ref_big = reference_forward(ctx_big, cand_big, w1, b1, w2, b2)
    assert out_big.shape == (b_big, N_CAND, OUT), out_big.shape
    assert jnp.allclose(out_big, ref_big, atol=3e-2, rtol=3e-2), \
        "mismatch (tiled)"

    print("KERNEL_OK")
</pallas_src>

<mosaic_0001>
module attributes {stable_mosaic.version = 11 : i64} {
  func.func @analogy_kernel(%arg0: i32, %arg1: memref<2x64xbf16, #tpu.memory_space<vmem>>, %arg2: memref<2x256xbf16, #tpu.memory_space<vmem>>, %arg3: memref<32x128xbf16, #tpu.memory_space<vmem>>, %arg4: memref<1x128xf32, #tpu.memory_space<vmem>>, %arg5: memref<256x1024xbf16, #tpu.memory_space<vmem>>, %arg6: memref<1024x256xbf16, #tpu.memory_space<vmem>>, %arg7: memref<1x256xf32, #tpu.memory_space<vmem>>, %arg8: memref<2x256xf32, #tpu.memory_space<vmem>>) attributes {dimension_semantics = [#tpu.dimension_semantics<parallel>], iteration_bounds = array<i64: 1>, scalar_prefetch = 0 : i64, scratch_operands = 0 : i64, tpu.core_type = #tpu.core_type<tc>, window_params = [{transform_indices = @transform_0, window_bounds = array<i64: 2, 64>}, {transform_indices = @transform_1, window_bounds = array<i64: 2, 256>}, {pipeline_mode = #tpu.pipeline_mode<synchronous>, transform_indices = @transform_2, window_bounds = array<i64: 32, 128>}, {pipeline_mode = #tpu.pipeline_mode<synchronous>, transform_indices = @transform_3, window_bounds = array<i64: 1, 128>}, {pipeline_mode = #tpu.pipeline_mode<synchronous>, transform_indices = @transform_4, window_bounds = array<i64: 256, 1024>}, {pipeline_mode = #tpu.pipeline_mode<synchronous>, transform_indices = @transform_5, window_bounds = array<i64: 1024, 256>}, {pipeline_mode = #tpu.pipeline_mode<synchronous>, transform_indices = @transform_6, window_bounds = array<i64: 1, 256>}, {transform_indices = @transform_7, window_bounds = array<i64: 2, 256>}]} {
    %c0 = arith.constant 0 : index
    %c0_0 = arith.constant 0 : index
    %0 = vector.load %arg1[%c0, %c0_0] : memref<2x64xbf16, #tpu.memory_space<vmem>>, vector<2x64xbf16>
    %1 = vector.extract_strided_slice %0 {offsets = [0, 0], sizes = [2, 32], strides = [1, 1]} : vector<2x64xbf16> to vector<2x32xbf16>
    %2 = vector.extract_strided_slice %0 {offsets = [0, 32], sizes = [2, 32], strides = [1, 1]} : vector<2x64xbf16> to vector<2x32xbf16>
    %3 = arith.subf %2, %1 : vector<2x32xbf16>
    %c0_1 = arith.constant 0 : index
    %c0_2 = arith.constant 0 : index
    %4 = vector.load %arg3[%c0_1, %c0_2] : memref<32x128xbf16, #tpu.memory_space<vmem>>, vector<32x128xbf16>
    %cst = arith.constant dense<0.000000e+00> : vector<2x128xf32>
    %5 = tpu.matmul %3, %4, %cst {dimension_numbers = #tpu.dot_dimension_numbers<[1], [0], [0], [1], [0, 0, 1, 1], [], []>} : vector<2x32xbf16>, vector<32x128xbf16>, vector<2x128xf32> -> vector<2x128xf32>
    %c0_3 = arith.constant 0 : index
    %c0_4 = arith.constant 0 : index
    %6 = vector.load %arg4[%c0_3, %c0_4] : memref<1x128xf32, #tpu.memory_space<vmem>>, vector<1x128xf32>
    %7 = vector.broadcast %6 : vector<1x128xf32> to vector<2x128xf32>
    %8 = arith.addf %5, %7 : vector<2x128xf32>
    %c0_5 = arith.constant 0 : index
    %c0_6 = arith.constant 0 : index
    %9 = vector.load %arg2[%c0_5, %c0_6] : memref<2x256xbf16, #tpu.memory_space<vmem>>, vector<2x256xbf16>
    %10 = tpu.concatenate %2, %2, %2, %2, %2, %2, %2, %2 in 1 : vector<2x32xbf16>, vector<2x32xbf16>, vector<2x32xbf16>, vector<2x32xbf16>, vector<2x32xbf16>, vector<2x32xbf16>, vector<2x32xbf16>, vector<2x32xbf16> -> vector<2x256xbf16>
    %11 = arith.subf %9, %10 : vector<2x256xbf16>
    %c0_7 = arith.constant 0 : index
    %c0_8 = arith.constant 0 : index
    %12 = vector.load %arg5[%c0_7, %c0_8] : memref<256x1024xbf16, #tpu.memory_space<vmem>>, vector<256x1024xbf16>
    %cst_9 = arith.constant dense<0.000000e+00> : vector<2x1024xf32>
    %13 = tpu.matmul %11, %12, %cst_9 {dimension_numbers = #tpu.dot_dimension_numbers<[1], [0], [0], [1], [0, 0, 1, 1], [], []>} : vector<2x256xbf16>, vector<256x1024xbf16>, vector<2x1024xf32> -> vector<2x1024xf32>
    %14 = tpu.concatenate %8, %8, %8, %8, %8, %8, %8, %8 in 1 : vector<2x128xf32>, vector<2x128xf32>, vector<2x128xf32>, vector<2x128xf32>, vector<2x128xf32>, vector<2x128xf32>, vector<2x128xf32>, vector<2x128xf32> -> vector<2x1024xf32>
    %15 = arith.addf %13, %14 : vector<2x1024xf32>
    %cst_10 = arith.constant 0.000000e+00 : f32
    %16 = vector.broadcast %cst_10 : f32 to vector<2x1024xf32>
    %17 = arith.maximumf %15, %16 : vector<2x1024xf32>
    %18 = arith.truncf %17 : vector<2x1024xf32> to vector<2x1024xbf16>
    %c0_11 = arith.constant 0 : index
    %c0_12 = arith.constant 0 : index
    %19 = vector.load %arg6[%c0_11, %c0_12] : memref<1024x256xbf16, #tpu.memory_space<vmem>>, vector<1024x256xbf16>
    %cst_13 = arith.constant dense<0.000000e+00> : vector<2x256xf32>
    %20 = tpu.matmul %18, %19, %cst_13 {dimension_numbers = #tpu.dot_dimension_numbers<[1], [0], [0], [1], [0, 0, 1, 1], [], []>} : vector<2x1024xbf16>, vector<1024x256xbf16>, vector<2x256xf32> -> vector<2x256xf32>
    %c0_14 = arith.constant 0 : index
    %c0_15 = arith.constant 0 : index
    %21 = vector.load %arg7[%c0_14, %c0_15] : memref<1x256xf32, #tpu.memory_space<vmem>>, vector<1x256xf32>
    %22 = vector.broadcast %21 : vector<1x256xf32> to vector<2x256xf32>
    %23 = arith.addf %20, %22 : vector<2x256xf32>
    %c0_16 = arith.constant 0 : index
    %c0_17 = arith.constant 0 : index
    %24 = vector.load %arg8[%c0_16, %c0_17] : memref<2x256xf32, #tpu.memory_space<vmem>>, vector<2x256xf32>
    tpu.vector_store %arg8[%c0_16, %c0_17], %23 {strides = array<i32>} : memref<2x256xf32, #tpu.memory_space<vmem>>, vector<2x256xf32>,
    return
  }
  func.func @transform_0(%arg0: i32) -> (i32, i32) {
    %c0_i32 = arith.constant 0 : i32
    %c0_i32_0 = arith.constant 0 : i32
    return %arg0, %c0_i32 : i32, i32
  }
  func.func @transform_1(%arg0: i32) -> (i32, i32) {
    %c0_i32 = arith.constant 0 : i32
    %c0_i32_0 = arith.constant 0 : i32
    return %arg0, %c0_i32 : i32, i32
  }
  func.func @transform_2(%arg0: i32) -> (i32, i32) {
    %c0_i32 = arith.constant 0 : i32
    %c0_i32_0 = arith.constant 0 : i32
    %c0_i32_1 = arith.constant 0 : i32
    return %c0_i32, %c0_i32_0 : i32, i32
  }
  func.func @transform_3(%arg0: i32) -> (i32, i32) {
    %c0_i32 = arith.constant 0 : i32
    %c0_i32_0 = arith.constant 0 : i32
    %c0_i32_1 = arith.constant 0 : i32
    return %c0_i32, %c0_i32_0 : i32, i32
  }
  func.func @transform_4(%arg0: i32) -> (i32, i32) {
    %c0_i32 = arith.constant 0 : i32
    %c0_i32_0 = arith.constant 0 : i32
    %c0_i32_1 = arith.constant 0 : i32
    return %c0_i32, %c0_i32_0 : i32, i32
  }
  func.func @transform_5(%arg0: i32) -> (i32, i32) {
    %c0_i32 = arith.constant 0 : i32
    %c0_i32_0 = arith.constant 0 : i32
    %c0_i32_1 = arith.constant 0 : i32
    return %c0_i32, %c0_i32_0 : i32, i32
  }
  func.func @transform_6(%arg0: i32) -> (i32, i32) {
    %c0_i32 = arith.constant 0 : i32
    %c0_i32_0 = arith.constant 0 : i32
    %c0_i32_1 = arith.constant 0 : i32
    return %c0_i32, %c0_i32_0 : i32, i32
  }
  func.func @transform_7(%arg0: i32) -> (i32, i32) {
    %c0_i32 = arith.constant 0 : i32
    %c0_i32_0 = arith.constant 0 : i32
    return %arg0, %c0_i32 : i32, i32
  }
}

</mosaic_0001>

<bundles_post_ra>
// kernel: constrative_analogy_forward.1
= control target key start
LH: loop header
LB: loop body
LE: loop exit
PB: predicated region body
PF: predicated region fallthrough
CT: control target
= control target key end

     0   :  { %v48_v0 = vlaneseq  ;;  %v2570_v2 = vmov 1966171168   ;;  %v2571_v6 = vmov 0.0   ;;  %s2572_s30 = smov 32   ;;  %vm2573_vm0 = vmmov 0   ;;  %s2574_s25 = smov 96   ;;  %s3480_s0 = inlined_call_operand.vmem [shape: bf16[2,64], index: 0, kind: input, shape index: {}]   ;;  %s3481_s4 = inlined_call_operand.vmem [shape: bf16[256,1024], index: 4, kind: input, shape index: {}]   ;;  %s3482_s2 = inlined_call_operand.vmem [shape: bf16[32,128], index: 2, kind: input, shape index: {}]   ;;  %s3483_s5 = inlined_call_operand.vmem [shape: bf16[1024,256], index: 5, kind: input, shape index: {}]   ;;  %s3484_s1 = inlined_call_operand.vmem [shape: bf16[2,256], index: 1, kind: input, shape index: {}]   ;;  %s3485_s3 = inlined_call_operand.vmem [shape: f32[1,128], index: 3, kind: input, shape index: {}]   ;;  %s3486_s6 = inlined_call_operand.vmem [shape: f32[1,256], index: 6, kind: input, shape index: {}]   ;;  %s3487_s7 = inlined_call_operand.vmem [shape: f32[2,256], index: 7, kind: output, shape index: {}]  }
   0x1   :  { %v2619_v1 = vld [vmem:[%s3480_s0] sm:$0x1]  ;;  %v46_v3 = vunpack.c.l.s4 %v2570_v2  ;;  %2362 = vmatprep.subr.bf16.mxu0 %v2571_v6  ;;  %2366 = vmatprep.mubr.msk.bf16.mxu0 %vm2573_vm0, %v2571_v6  ;;  %v2376_v22 = vld [vmem:[%s3482_s2 + $0x8] sm:$0xff]   ;;  %s2575_s28 = smov 64   ;;  %vm73_vm1 = vcmask 261120   ;;  %vm141_vm2 = vcmask 523264  }
   0x2   :  { %v221_v4 = vld [vmem:[%s3481_s4 + $0x1c0] sm:$0xff]  ;;  %29 = vrot.lane.b32.xlu0 %v2619_v1, %s2572_s30  ;;  %v2629_v7 = vshrl.u32 %v48_v0, 7  ;;  %2363 = vmatpush3.bf16.msra.mxu0 %v2376_v22  ;;  %v2674_v29 = vld [vmem:[%s3481_s4 + $0x1c8] sm:$0xff]  ;;  %vm144_vm3 = vcmask 785408  }
   0x3   :  { %v225_v5 = vld [vmem:[%s3481_s4 + $0x1e0] sm:$0xff]  ;;  %v47_v12 = vunpack.c.0.s8 %v46_v3  ;;  %2364 = vmatprep.subr.bf16.mxu0 %v2571_v6  ;;  %v2679_v30 = vld [vmem:[%s3481_s4 + $0x1e8] sm:$0xff] }
   0x4   :  { %v2159_v8 = vcombine.high %v221_v4, %v225_v5  ;;  %v2158_v9 = vcombine.low %v221_v4, %v225_v5  ;;  %v213_v10 = vld [vmem:[%s3481_s4 + $0x180] sm:$0xff]  ;;  %v2160_v31 = vcombine.low %v2674_v29, %v2679_v30  ;;  %v2161_v32 = vcombine.high %v2674_v29, %v2679_v30 }
   0x5   :  { %v217_v11 = vld [vmem:[%s3481_s4 + $0x1a0] sm:$0xff]  ;;  %v2644_v16 = vsub.s32 %v47_v12, %v2629_v7 }
   0x6   :  { %v2151_v13 = vcombine.high %v213_v10, %v217_v11  ;;  %v205_v14 = vld [vmem:[%s3481_s4 + $0x140] sm:$0xff]  ;;  %958 = vmatprep.subr.bf16.mxu1 %v2159_v8  ;;  %v2150_v17 = vcombine.low %v213_v10, %v217_v11 }
   0x7   :  { %v209_v15 = vld [vmem:[%s3481_s4 + $0x160] sm:$0xff]  ;;  %959 = vmatpush1.bf16.msra.mxu1 %v2158_v9  ;;  %v124_v19 = vrot.slane %v2619_v1, %v2644_v16 }
   0x8   :  { %960 = vmatprep.subr.bf16.mxu1 %v2151_v13  ;;  %v2143_v18 = vcombine.high %v205_v14, %v209_v15  ;;  %v197_v20 = vld [vmem:[%s3481_s4 + $0x100] sm:$0xff]  ;;  %v2142_v24 = vcombine.low %v205_v14, %v209_v15 }
   0x9   :  { %v201_v21 = vld [vmem:[%s3481_s4 + $0x120] sm:$0xff]  ;;  %v2658_v23 = vrot.slane %v124_v19, %v2644_v16 }
   0xa   :  { %v2135_v25 = vcombine.high %v197_v20, %v201_v21  ;;  %v189_v26 = vld [vmem:[%s3481_s4 + $0xc0] sm:$0xff]  ;;  %v2134_v33 = vcombine.low %v197_v20, %v201_v21 }
   0xb   :  { %961 = vmatpush1.bf16.msra.mxu1 %v2150_v17  ;;  %v2377_v27 = vld [vmem:[%s3482_s2] sm:$0xff]   ;;  %132 = vrot.lane.b32.xlu1 %v2658_v23, %s2574_s25 }
   0xc   :  { %962 = vmatprep.subr.bf16.mxu1 %v2143_v18  ;;  %v193_v28 = vld [vmem:[%s3481_s4 + $0xe0] sm:$0xff]  ;;  %2365 = vmatpush3.bf16.msra.mxu0 %v2377_v27 }
   0xd   :  { %v2127_v34 = vcombine.high %v189_v26, %v193_v28  ;;  %v181_v35 = vld [vmem:[%s3481_s4 + $0x80] sm:$0xff]  ;;  %999 = vmatprep.subr.bf16.mxu0 %v2161_v32  ;;  %v2126_v37 = vcombine.low %v189_v26, %v193_v28  ;;  %v218_v32 = vld [vmem:[%s3481_s4 + $0x1a8] sm:$0xff] }
   0xe   :  { %v185_v36 = vld [vmem:[%s3481_s4 + $0xa0] sm:$0xff] }
   0xf   :  { %963 = vmatpush1.bf16.msra.mxu1 %v2142_v24  ;;  %134 = vrot.lane.b32.xlu1 %v2658_v23, %s2572_s30  ;;  %v2119_v38 = vcombine.high %v181_v35, %v185_v36  ;;  %v173_v39 = vld [vmem:[%s3481_s4 + $0x40] sm:$0xff]  ;;  %v2118_v41 = vcombine.low %v181_v35, %v185_v36  ;;  %v2761_v24 = vld [vmem:[%s3481_s4 + $0x1d0] sm:$0xff] }
  0x10   :  { %964 = vmatprep.subr.bf16.mxu1 %v2135_v25  ;;  %v177_v40 = vld [vmem:[%s3481_s4 + $0x60] sm:$0xff]  ;;  %v2766_v25 = vld [vmem:[%s3481_s4 + $0x1f0] sm:$0xff] }
  0x11   :  { %v2111_v42 = vcombine.high %v173_v39, %v177_v40  ;;  %v165_v43 = vld [vmem:[%s3481_s4] sm:$0xff]  ;;  %v2110_v45 = vcombine.low %v173_v39, %v177_v40  ;;  %v2162_v26 = vcombine.low %v2761_v24, %v2766_v25  ;;  %v2163_v27 = vcombine.high %v2761_v24, %v2766_v25  ;;  %v195_v24 = vld [vmem:[%s3481_s4 + $0xf0] sm:$0xff] }
  0x12   :  { %v169_v44 = vld [vmem:[%s3481_s4 + $0x20] sm:$0xff] }
  0x13   :  { %965 = vmatpush1.bf16.msra.mxu1 %v2134_v33  ;;  %v2103_v46 = vcombine.high %v165_v43, %v169_v44  ;;  %v285_v47 = vld [vmem:[%s3481_s4 + $0x3c0] sm:$0xff]  ;;  %v2102_v49 = vcombine.low %v165_v43, %v169_v44  ;;  %v202_v43 = vld [vmem:[%s3481_s4 + $0x128] sm:$0xff] }
  0x14   :  { %966 = vmatprep.subr.bf16.mxu1 %v2127_v34  ;;  %v289_v48 = vld [vmem:[%s3481_s4 + $0x3e0] sm:$0xff] }
  0x15   :  { %v2223_v50 = vcombine.high %v285_v47, %v289_v48  ;;  %v277_v51 = vld [vmem:[%s3481_s4 + $0x380] sm:$0xff]  ;;  %v2222_v53 = vcombine.low %v285_v47, %v289_v48  ;;  %v194_v47 = vld [vmem:[%s3481_s4 + $0xe8] sm:$0xff] }
  0x16   :  { %v281_v52 = vld [vmem:[%s3481_s4 + $0x3a0] sm:$0xff] }
  0x17   :  { %967 = vmatpush1.bf16.msra.mxu1 %v2126_v37  ;;  %v2215_v54 = vcombine.high %v277_v51, %v281_v52  ;;  %v269_v55 = vld [vmem:[%s3481_s4 + $0x340] sm:$0xff]  ;;  %v2214_v57 = vcombine.low %v277_v51, %v281_v52  ;;  %v206_v37 = vld [vmem:[%s3481_s4 + $0x148] sm:$0xff] }
  0x18   :  { %968 = vmatprep.subr.bf16.mxu1 %v2119_v38  ;;  %v273_v56 = vld [vmem:[%s3481_s4 + $0x360] sm:$0xff]  ;;  %v210_v38 = vld [vmem:[%s3481_s4 + $0x168] sm:$0xff] }
  0x19   :  { %v2207_v58 = vcombine.high %v269_v55, %v273_v56  ;;  %v261_v59 = vld [vmem:[%s3481_s4 + $0x300] sm:$0xff]  ;;  %v2206_v61 = vcombine.low %v269_v55, %v273_v56 }
  0x1a   :  { %v265_v60 = vld [vmem:[%s3481_s4 + $0x320] sm:$0xff] }
  0x1b   :  { %969 = vmatpush1.bf16.msra.mxu1 %v2118_v41  ;;  %v2199_v62 = vcombine.high %v261_v59, %v265_v60  ;;  %v2198_v63 = vcombine.low %v261_v59, %v265_v60  ;;  %v253_v0 = vld [vmem:[%s3481_s4 + $0x2c0] sm:$0xff]  ;;  %v215_v59 = vld [vmem:[%s3481_s4 + $0x190] sm:$0xff] }
  0x1c   :  { %970 = vmatprep.subr.bf16.mxu1 %v2111_v42  ;;  %v257_v2 = vld [vmem:[%s3481_s4 + $0x2e0] sm:$0xff]  ;;  %v198_v42 = vld [vmem:[%s3481_s4 + $0x108] sm:$0xff]  ;;  %v219_v60 = vld [vmem:[%s3481_s4 + $0x1b0] sm:$0xff] }
  0x1d   :  { %v2191_v3 = vcombine.high %v253_v0, %v257_v2  ;;  %v2190_v4 = vcombine.low %v253_v0, %v257_v2  ;;  %v245_v5 = vld [vmem:[%s3481_s4 + $0x280] sm:$0xff]  ;;  %v2137_v29 = vcombine.high %v198_v42, %v202_v43 }
  0x1e   :  { %v249_v6 = vld [vmem:[%s3481_s4 + $0x2a0] sm:$0xff] }
  0x1f   :  { %971 = vmatpush1.bf16.msra.mxu1 %v2110_v45  ;;  %v2183_v9 = vcombine.high %v245_v5, %v249_v6  ;;  %v2182_v11 = vcombine.low %v245_v5, %v249_v6  ;;  %v237_v13 = vld [vmem:[%s3481_s4 + $0x240] sm:$0xff]  ;;  %v207_v5 = vld [vmem:[%s3481_s4 + $0x150] sm:$0xff] }
  0x20   :  { %972 = vmatprep.subr.bf16.mxu1 %v2103_v46  ;;  %v241_v14 = vld [vmem:[%s3481_s4 + $0x260] sm:$0xff]  ;;  %v2144_v46 = vcombine.low %v206_v37, %v210_v38  ;;  %v211_v6 = vld [vmem:[%s3481_s4 + $0x170] sm:$0xff] }
  0x21   :  { %v2175_v15 = vcombine.high %v237_v13, %v241_v14  ;;  %v2174_v18 = vcombine.low %v237_v13, %v241_v14  ;;  %v229_v19 = vld [vmem:[%s3481_s4 + $0x200] sm:$0xff]  ;;  %v199_v13 = vld [vmem:[%s3481_s4 + $0x110] sm:$0xff] }
  0x22   :  { %v233_v20 = vld [vmem:[%s3481_s4 + $0x220] sm:$0xff]  ;;  %v203_v14 = vld [vmem:[%s3481_s4 + $0x130] sm:$0xff] }
  0x23   :  { %973 = vmatpush1.bf16.msra.mxu1 %v2102_v49  ;;  %v2167_v21 = vcombine.high %v229_v19, %v233_v20  ;;  %v2166_v22 = vcombine.low %v229_v19, %v233_v20  ;;  %v117_v48 = vld [vmem:[%s3484_s1] sm:$0x3]  ;;  %v2146_v19 = vcombine.low %v207_v5, %v211_v6  ;;  %v278_v20 = vld [vmem:[%s3481_s4 + $0x388] sm:$0xff] }
  0x24   :  { %974 = vmatprep.subr.bf16.mxu1 %v2223_v50  ;;  %v2136_v50 = vcombine.low %v198_v42, %v202_v43 }
  0x27   :  { %975 = vmatpush2.bf16.msra.mxu1 %v2222_v53  ;;  %v182_v53 = vld [vmem:[%s3481_s4 + $0x88] sm:$0xff] }
  0x28   :  { %976 = vmatprep.subr.bf16.mxu1 %v2215_v54  ;;  %v186_v54 = vld [vmem:[%s3481_s4 + $0xa8] sm:$0xff] }
  0x29   :  { %v2120_v2 = vcombine.low %v182_v53, %v186_v54 }
  0x2b   :  { %977 = vmatpush2.bf16.msra.mxu1 %v2214_v57  ;;  %v174_v57 = vld [vmem:[%s3481_s4 + $0x48] sm:$0xff] }
  0x2c   :  { %978 = vmatprep.subr.bf16.mxu1 %v2207_v58  ;;  %v178_v58 = vld [vmem:[%s3481_s4 + $0x68] sm:$0xff] }
  0x2f   :  { %979 = vmatpush2.bf16.msra.mxu1 %v2206_v61  ;;  %v2121_v61 = vcombine.high %v182_v53, %v186_v54  ;;  %v287_v53 = vld [vmem:[%s3481_s4 + $0x3d0] sm:$0xff] }
  0x30   :  { %980 = vmatprep.subr.bf16.mxu1 %v2199_v62  ;;  %v291_v54 = vld [vmem:[%s3481_s4 + $0x3f0] sm:$0xff] }
  0x33   :  { %981 = vmatpush2.bf16.msra.mxu1 %v2198_v63 }
  0x34   :  { %982 = vmatprep.subr.bf16.mxu1 %v2191_v3  ;;  %v166_v3 = vld [vmem:[%s3481_s4 + $0x8] sm:$0xff] }
  0x37   :  { %983 = vmatpush2.bf16.msra.mxu1 %v2190_v4  ;;  %v170_v4 = vld [vmem:[%s3481_s4 + $0x28] sm:$0xff] }
  0x38   :  { %984 = vmatprep.subr.bf16.mxu1 %v2183_v9  ;;  %v2112_v9 = vcombine.low %v174_v57, %v178_v58 }
  0x3b   :  { %985 = vmatpush2.bf16.msra.mxu1 %v2182_v11  ;;  %v286_v11 = vld [vmem:[%s3481_s4 + $0x3c8] sm:$0xff] }
  0x3c   :  { %986 = vmatprep.subr.bf16.mxu1 %v2175_v15  ;;  %v2105_v15 = vcombine.high %v166_v3, %v170_v4 }
  0x3f   :  { %987 = vmatpush2.bf16.msra.mxu1 %v2174_v18  ;;  %v2104_v18 = vcombine.low %v166_v3, %v170_v4  ;;  %v2227_v3 = vcombine.high %v287_v53, %v291_v54 }
  0x40   :  { %988 = vmatprep.subr.bf16.mxu1 %v2167_v21  ;;  %v282_v21 = vld [vmem:[%s3481_s4 + $0x3a8] sm:$0xff] }
  0x43   :  { %989 = vmatpush2.bf16.msra.mxu1 %v2166_v22  ;;  %v191_v22 = vld [vmem:[%s3481_s4 + $0xd0] sm:$0xff] }
  0x44   :  { %1040 = vmatprep.subr.bf16.mxu1 %v2163_v27 }
  0x74   :  { %v30_v8 = vpop.permute.xlu0 %29 }
  0x75   :  { %v32_v10 = vsub.bf16 %v2619_v1, %v30_v8  ;;  %v2155_v8 = vcombine.high %v215_v59, %v219_v60 }
  0x77   :  { %v51_v12 = vrot.slane %v32_v10, %v2644_v16  ;;  %v2154_v10 = vcombine.low %v215_v59, %v219_v60  ;;  %v238_v59 = vld [vmem:[%s3481_s4 + $0x248] sm:$0xff] }
  0x78   :  { %v242_v60 = vld [vmem:[%s3481_s4 + $0x268] sm:$0xff] }
  0x79   :  { %v58_v17 = vrot.slane %v51_v12, %v2644_v16  ;;  %v290_v12 = vld [vmem:[%s3481_s4 + $0x3e8] sm:$0xff] }
  0x7a   :  { %v2225_v25 = vcombine.high %v286_v11, %v290_v12  ;;  %v2224_v27 = vcombine.low %v286_v11, %v290_v12  ;;  %v275_v11 = vld [vmem:[%s3481_s4 + $0x370] sm:$0xff]  ;;  %v2176_v12 = vcombine.low %v238_v59, %v242_v60 }
  0x7b   :  { %59 = vrot.lane.b32.xlu0 %v58_v17, %s2574_s25  ;;  %v2147_v17 = vcombine.high %v207_v5, %v211_v6  ;;  %v2226_v5 = vcombine.low %v287_v53, %v291_v54  ;;  %v2177_v6 = vcombine.high %v238_v59, %v242_v60  ;;  %v2380_v60 = vld [vmem:[%s3483_s5 + $0x74] ss:$8 sps:$4 sm:$0xff]  }
  0x7d   :  { %v133_v28 = vpop.permute.xlu1 %132 }
  0x7e   :  { %v140_v33 = vsel %vm73_vm1, %v133_v28, %v2619_v1  ;;  %v2145_v1 = vcombine.high %v206_v37, %v210_v38  ;;  %v2138_v28 = vcombine.low %v199_v13, %v203_v14  ;;  %v2216_v37 = vcombine.low %v278_v20, %v282_v21 }
  0x7f   :  { %136 = vrot.lane.b32.xlu0 %v2658_v23, %s2575_s28  ;;  %v214_v23 = vld [vmem:[%s3481_s4 + $0x188] sm:$0xff]  ;;  %v2130_v38 = vcombine.low %v191_v22, %v195_v24 }
  0x80   :  { %v2153_v35 = vcombine.high %v214_v23, %v218_v32  ;;  %v2152_v40 = vcombine.low %v214_v23, %v218_v32  ;;  %v270_v23 = vld [vmem:[%s3481_s4 + $0x348] sm:$0xff] }
  0x81   :  { %v135_v34 = vpop.permute.xlu1 %134  ;;  %v274_v32 = vld [vmem:[%s3481_s4 + $0x368] sm:$0xff] }
  0x82   :  { %v143_v39 = vsel %vm141_vm2, %v140_v33, %v135_v34  ;;  %v183_v33 = vld [vmem:[%s3481_s4 + $0x90] sm:$0xff]  ;;  %v2209_v42 = vcombine.high %v270_v23, %v274_v32 }
  0x83   :  { %v187_v34 = vld [vmem:[%s3481_s4 + $0xb0] sm:$0xff] }
  0x84   :  { %v2123_v43 = vcombine.high %v183_v33, %v187_v34 }
  0xed   :  { %v60_v36 = vpop.permute.xlu0 %59 }
  0xee   :  { %2367 = vmatmul.mubr.msk.bf16.vlgmr.msra.gmra.mxu0 %vm73_vm1, %v60_v36  ;;  %v2131_v36 = vcombine.high %v191_v22, %v195_v24 }
  0xef   :  { %1000 = vmatpush1.bf16.msra.mxu0 %v2160_v31  ;;  %v190_v31 = vld [vmem:[%s3481_s4 + $0xc8] sm:$0xff] }
  0xf0   :  { %1001 = vmatprep.subr.bf16.mxu0 %v2153_v35  ;;  %v2129_v51 = vcombine.high %v190_v31, %v194_v47  ;;  %v2128_v56 = vcombine.low %v190_v31, %v194_v47  ;;  %v2217_v35 = vcombine.high %v278_v20, %v282_v21  ;;  %v171_v31 = vld [vmem:[%s3481_s4 + $0x30] sm:$0xff]  ;;  %v228_v20 = vld [vmem:[%s3481_s4 + $0x1f8] sm:$0xff] }
  0xf1   :  { %v137_v41 = vpop.permute.xlu0 %136 }
  0xf2   :  { %v146_v44 = vsel %vm144_vm3, %v143_v39, %v137_v41  ;;  %v262_v39 = vld [vmem:[%s3481_s4 + $0x308] sm:$0xff]  ;;  %v179_v41 = vld [vmem:[%s3481_s4 + $0x70] sm:$0xff] }
  0xf3   :  { %v148_v45 = vcombine.low %v146_v44, %v146_v44  ;;  %1002 = vmatpush1.bf16.msra.mxu0 %v2152_v40  ;;  %v266_v40 = vld [vmem:[%s3481_s4 + $0x328] sm:$0xff]  ;;  %v2208_v44 = vcombine.low %v270_v23, %v274_v32  ;;  %v220_v23 = vld [vmem:[%s3481_s4 + $0x1b8] sm:$0xff] }
  0xf4   :  { %1003 = vmatprep.subr.bf16.mxu0 %v2145_v1  ;;  %v175_v1 = vld [vmem:[%s3481_s4 + $0x50] sm:$0xff]  ;;  %v2201_v47 = vcombine.high %v262_v39, %v266_v40 }
  0xf5   :  { %v155_v30 = vrot.slane %v148_v45, %v2644_v16  ;;  %v2122_v45 = vcombine.low %v183_v33, %v187_v34 }
  0xf7   :  { %v162_v49 = vrot.slane %v155_v30, %v2644_v16  ;;  %1004 = vmatpush1.bf16.msra.mxu0 %v2144_v46  ;;  %v254_v46 = vld [vmem:[%s3481_s4 + $0x2c8] sm:$0xff]  ;;  %v167_v30 = vld [vmem:[%s3481_s4 + $0x10] sm:$0xff] }
  0xf8   :  { %1005 = vmatprep.subr.bf16.mxu0 %v2137_v29  ;;  %v258_v29 = vld [vmem:[%s3481_s4 + $0x2e8] sm:$0xff] }
  0xf9   :  { %v164_v52 = vsub.bf16 %v117_v48, %v162_v49  ;;  %v2115_v48 = vcombine.high %v175_v1, %v179_v41  ;;  %v2200_v49 = vcombine.low %v262_v39, %v266_v40  ;;  %v212_v39 = vld [vmem:[%s3481_s4 + $0x178] sm:$0xff] }
  0xfb   :  { %v300_v55 = vrot.slane %v164_v52, %v2644_v16  ;;  %1006 = vmatpush1.bf16.msra.mxu0 %v2136_v50  ;;  %v2114_v50 = vcombine.low %v175_v1, %v179_v41  ;;  %v250_v52 = vld [vmem:[%s3481_s4 + $0x2a8] sm:$0xff] }
  0xfc   :  { %1007 = vmatprep.subr.bf16.mxu0 %v2129_v51  ;;  %v246_v51 = vld [vmem:[%s3481_s4 + $0x288] sm:$0xff] }
  0xfd   :  { %v301_v62 = vcombine.high %v300_v55, %v300_v55  ;;  %v2825_v63 = vrot.slane %v300_v55, %v2644_v16  ;;  %v2193_v55 = vcombine.high %v254_v46, %v258_v29  ;;  %v2184_v4 = vcombine.low %v246_v51, %v250_v52 }
  0xff   :  { %1008 = vmatpush1.bf16.msra.mxu0 %v2128_v56  ;;  %v2828_v0 = vrot.slane %v301_v62, %v2644_v16  ;;  %v2113_v16 = vcombine.high %v174_v57, %v178_v58  ;;  %v2107_v56 = vcombine.high %v167_v30, %v171_v31  ;;  %v2192_v57 = vcombine.low %v254_v46, %v258_v29  ;;  %v283_v62 = vld [vmem:[%s3481_s4 + $0x3b0] sm:$0xff] }
 0x100   :  { %1009 = vmatprep.subr.bf16.mxu0 %v2121_v61  ;;  %v2106_v58 = vcombine.low %v167_v30, %v171_v31  ;;  %v279_v61 = vld [vmem:[%s3481_s4 + $0x390] sm:$0xff] }
 0x101   :  { %990 = vmatprep.mubr.bf16.mxu1 %v2828_v0  ;;  %1031 = vmatprep.mubr.bf16.mxu0 %v2828_v0 }
 0x102   :  { %991 = vmatmul.mubr.bf16.vlgmr.msra.gmra.mxu1 %v2825_v63 }
 0x103   :  { %1010 = vmatpush1.bf16.msra.mxu0 %v2120_v2  ;;  %1041 = vmatpush1.bf16.msra.mxu1 %v2162_v26  ;;  %v2139_v26 = vcombine.high %v199_v13, %v203_v14  ;;  %v2185_v2 = vcombine.high %v246_v51, %v250_v52  ;;  %v2218_v13 = vcombine.low %v279_v61, %v283_v62 }
 0x104   :  { %1011 = vmatprep.subr.bf16.mxu0 %v2113_v16  ;;  %1042 = vmatprep.subr.bf16.mxu1 %v2155_v8  ;;  %v2219_v16 = vcombine.high %v279_v61, %v283_v62  ;;  %v230_v8 = vld [vmem:[%s3481_s4 + $0x208] sm:$0xff]  ;;  %v176_v61 = vld [vmem:[%s3481_s4 + $0x58] sm:$0xff] }
 0x105   :  { %1072 = vmatprep.mubr.bf16.mxu1 %v2828_v0  ;;  %v180_v62 = vld [vmem:[%s3481_s4 + $0x78] sm:$0xff] }
 0x107   :  { %1012 = vmatpush1.bf16.msra.mxu0 %v2112_v9  ;;  %1043 = vmatpush1.bf16.msra.mxu1 %v2154_v10  ;;  %v234_v9 = vld [vmem:[%s3481_s4 + $0x228] sm:$0xff]  ;;  %v271_v10 = vld [vmem:[%s3481_s4 + $0x350] sm:$0xff] }
 0x108   :  { %1013 = vmatprep.subr.bf16.mxu0 %v2105_v15  ;;  %1044 = vmatprep.subr.bf16.mxu1 %v2147_v17  ;;  %v2169_v14 = vcombine.high %v230_v8, %v234_v9  ;;  %v2211_v15 = vcombine.high %v271_v10, %v275_v11  ;;  %v263_v17 = vld [vmem:[%s3481_s4 + $0x310] sm:$0xff]  ;;  %v2168_v21 = vcombine.low %v230_v8, %v234_v9  ;;  %v2381_v9 = vld [vmem:[%s3483_s5 + $0x60] ss:$8 sps:$4 sm:$0xff]  }
 0x109   :  { %v2210_v22 = vcombine.low %v271_v10, %v275_v11  ;;  %v2116_v8 = vcombine.low %v176_v61, %v180_v62  ;;  %v2386_v11 = vld [vmem:[%s3483_s5 + $0x54] ss:$8 sps:$4 sm:$0xff]  }
 0x10b   :  { %1014 = vmatpush1.bf16.msra.mxu0 %v2104_v18  ;;  %1045 = vmatpush1.bf16.msra.mxu1 %v2146_v19  ;;  %v267_v18 = vld [vmem:[%s3481_s4 + $0x330] sm:$0xff]  ;;  %v224_v19 = vld [vmem:[%s3481_s4 + $0x1d8] sm:$0xff] }
 0x10c   :  { %1015 = vmatprep.subr.bf16.mxu0 %v2225_v25  ;;  %1046 = vmatprep.subr.bf16.mxu1 %v2139_v26  ;;  %v2203_v24 = vcombine.high %v263_v17, %v267_v18  ;;  %v2165_v25 = vcombine.high %v224_v19, %v228_v20  ;;  %v255_v26 = vld [vmem:[%s3481_s4 + $0x2d0] sm:$0xff]  ;;  %v2202_v32 = vcombine.low %v263_v17, %v267_v18  ;;  %v2389_v18 = vld [vmem:[%s3483_s5 + $0x44] ss:$8 sps:$4 sm:$0xff]  }
 0x10d   :  { %v2164_v33 = vcombine.low %v224_v19, %v228_v20  ;;  %v280_v19 = vld [vmem:[%s3481_s4 + $0x398] sm:$0xff] }
 0x10e   :  { %v284_v20 = vld [vmem:[%s3481_s4 + $0x3b8] sm:$0xff] }
 0x10f   :  { %1016 = vmatpush2.bf16.msra.mxu0 %v2224_v27  ;;  %1047 = vmatpush1.bf16.msra.mxu1 %v2138_v28  ;;  %v259_v27 = vld [vmem:[%s3481_s4 + $0x2f0] sm:$0xff]  ;;  %v216_v28 = vld [vmem:[%s3481_s4 + $0x198] sm:$0xff] }
 0x110   :  { %1017 = vmatprep.subr.bf16.mxu0 %v2217_v35  ;;  %1048 = vmatprep.subr.bf16.mxu1 %v2131_v36  ;;  %v2195_v34 = vcombine.high %v255_v26, %v259_v27  ;;  %v247_v35 = vld [vmem:[%s3481_s4 + $0x290] sm:$0xff]  ;;  %v2157_v36 = vcombine.high %v216_v28, %v220_v23  ;;  %v2194_v40 = vcombine.low %v255_v26, %v259_v27  ;;  %v272_v26 = vld [vmem:[%s3481_s4 + $0x358] sm:$0xff] }
 0x111   :  { %v2156_v1 = vcombine.low %v216_v28, %v220_v23  ;;  %v276_v27 = vld [vmem:[%s3481_s4 + $0x378] sm:$0xff]  ;;  %v2220_v28 = vcombine.low %v280_v19, %v284_v20 }
 0x112   :  { %v2390_v23 = vld [vmem:[%s3483_s5 + $0x30] ss:$8 sps:$4 sm:$0xff]  }
 0x113   :  { %1018 = vmatpush2.bf16.msra.mxu0 %v2216_v37  ;;  %1049 = vmatpush1.bf16.msra.mxu1 %v2130_v38  ;;  %v251_v37 = vld [vmem:[%s3481_s4 + $0x2b0] sm:$0xff]  ;;  %v208_v38 = vld [vmem:[%s3481_s4 + $0x158] sm:$0xff] }
 0x114   :  { %1019 = vmatprep.subr.bf16.mxu0 %v2209_v42  ;;  %1050 = vmatprep.subr.bf16.mxu1 %v2123_v43  ;;  %v2187_v41 = vcombine.high %v247_v35, %v251_v37  ;;  %v2149_v42 = vcombine.high %v208_v38, %v212_v39  ;;  %v239_v43 = vld [vmem:[%s3481_s4 + $0x250] sm:$0xff]  ;;  %v2186_v46 = vcombine.low %v247_v35, %v251_v37  ;;  %v268_v35 = vld [vmem:[%s3481_s4 + $0x338] sm:$0xff]  ;;  %v2393_v37 = vld [vmem:[%s3483_s5 + $0x20] ss:$8 sps:$4 sm:$0xff]  }
 0x115   :  { %v2148_v29 = vcombine.low %v208_v38, %v212_v39  ;;  %v2398_v39 = vld [vmem:[%s3483_s5 + $0x14] ss:$8 sps:$4 sm:$0xff]  }
 0x117   :  { %1020 = vmatpush2.bf16.msra.mxu0 %v2208_v44  ;;  %1051 = vmatpush1.bf16.msra.mxu1 %v2122_v45  ;;  %v243_v44 = vld [vmem:[%s3481_s4 + $0x270] sm:$0xff]  ;;  %v200_v45 = vld [vmem:[%s3481_s4 + $0x118] sm:$0xff] }
 0x118   :  { %1021 = vmatprep.subr.bf16.mxu0 %v2201_v47  ;;  %1052 = vmatprep.subr.bf16.mxu1 %v2115_v48  ;;  %v2179_v30 = vcombine.high %v239_v43, %v243_v44  ;;  %v231_v47 = vld [vmem:[%s3481_s4 + $0x210] sm:$0xff]  ;;  %v2178_v51 = vcombine.low %v239_v43, %v243_v44  ;;  %v2401_v44 = vld [vmem:[%s3483_s5 + $0x4] ss:$8 sps:$4 sm:$0xff]  }
 0x119   :  { %v235_v48 = vld [vmem:[%s3481_s4 + $0x230] sm:$0xff] }
 0x11a   :  { %v2171_v53 = vcombine.high %v231_v47, %v235_v48 }
 0x11b   :  { %1022 = vmatpush2.bf16.msra.mxu0 %v2200_v49  ;;  %1053 = vmatpush1.bf16.msra.mxu1 %v2114_v50  ;;  %v192_v49 = vld [vmem:[%s3481_s4 + $0xd8] sm:$0xff] }
 0x11c   :  { %1023 = vmatprep.subr.bf16.mxu0 %v2193_v55  ;;  %1054 = vmatprep.subr.bf16.mxu1 %v2107_v56  ;;  %v196_v50 = vld [vmem:[%s3481_s4 + $0xf8] sm:$0xff] }
 0x11d   :  { %v2133_v54 = vcombine.high %v192_v49, %v196_v50  ;;  %v184_v55 = vld [vmem:[%s3481_s4 + $0x98] sm:$0xff] }
 0x11e   :  { %v188_v56 = vld [vmem:[%s3481_s4 + $0xb8] sm:$0xff] }
 0x11f   :  { %1024 = vmatpush2.bf16.msra.mxu0 %v2192_v57  ;;  %1055 = vmatpush1.bf16.msra.mxu1 %v2106_v58  ;;  %v2170_v57 = vcombine.low %v231_v47, %v235_v48  ;;  %v2132_v58 = vcombine.low %v192_v49, %v196_v50  ;;  %v2125_v59 = vcombine.high %v184_v55, %v188_v56  ;;  %v240_v47 = vld [vmem:[%s3481_s4 + $0x258] sm:$0xff] }
 0x120   :  { %1025 = vmatprep.subr.bf16.mxu0 %v2185_v2  ;;  %1056 = vmatprep.subr.bf16.mxu1 %v2227_v3  ;;  %v2124_v2 = vcombine.low %v184_v55, %v188_v56  ;;  %v2378_v3 = vld [vmem:[%s3483_s5 + $0x70] ss:$8 sps:$4 sm:$0xff]   ;;  %v2405_v56 = vld [vmem:[%s3483_s5 + $0xe0] ss:$8 sps:$4 sm:$0xff]  }
 0x121   :  { %v244_v48 = vld [vmem:[%s3481_s4 + $0x278] sm:$0xff] }
 0x122   :  { %v2402_v50 = vld [vmem:[%s3483_s5 + $0xf0] ss:$8 sps:$4 sm:$0xff]   ;;  %v2180_v55 = vcombine.low %v240_v47, %v244_v48 }
 0x123   :  { %1026 = vmatpush2.bf16.msra.mxu0 %v2184_v4  ;;  %1057 = vmatpush2.bf16.msra.mxu1 %v2226_v5  ;;  %v2117_v4 = vcombine.high %v176_v61, %v180_v62  ;;  %v2383_v5 = vld [vmem:[%s3483_s5 + $0x64] ss:$8 sps:$4 sm:$0xff]   ;;  %v2416_v62 = vld [vmem:[%s3483_s5 + $0x174] ss:$8 sps:$4 sm:$0xff]  }
 0x124   :  { %1027 = vmatprep.subr.bf16.mxu0 %v2177_v6  ;;  %1058 = vmatprep.subr.bf16.mxu1 %v2219_v16  ;;  %v168_v6 = vld [vmem:[%s3481_s4 + $0x18] sm:$0xff]  ;;  %v2413_v61 = vld [vmem:[%s3483_s5 + $0xc4] ss:$8 sps:$4 sm:$0xff]  }
 0x125   :  { %v172_v16 = vld [vmem:[%s3481_s4 + $0x38] sm:$0xff] }
 0x126   :  { %v2109_v10 = vcombine.high %v168_v6, %v172_v16 }
 0x127   :  { %1028 = vmatpush2.bf16.msra.mxu0 %v2176_v12  ;;  %1059 = vmatpush2.bf16.msra.mxu1 %v2218_v13  ;;  %v288_v12 = vld [vmem:[%s3481_s4 + $0x3d8] sm:$0xff] }
 0x128   :  { %1029 = vmatprep.subr.bf16.mxu0 %v2169_v14  ;;  %1060 = vmatprep.subr.bf16.mxu1 %v2211_v15  ;;  %v292_v13 = vld [vmem:[%s3481_s4 + $0x3f8] sm:$0xff]  ;;  %v2108_v14 = vcombine.low %v168_v6, %v172_v16  ;;  %v2420_v16 = vld [vmem:[%s3483_s5 + $0x160] ss:$8 sps:$4 sm:$0xff]  }
 0x129   :  { %v2384_v15 = vld [vmem:[%s3483_s5 + $0x50] ss:$8 sps:$4 sm:$0xff]   ;;  %v2229_v17 = vcombine.high %v288_v12, %v292_v13 }
 0x12a   :  { %v2417_v6 = vld [vmem:[%s3483_s5 + $0xb0] ss:$8 sps:$4 sm:$0xff]  }
 0x12b   :  { %1030 = vmatpush2.bf16.msra.mxu0 %v2168_v21  ;;  %1061 = vmatpush2.bf16.msra.mxu1 %v2210_v22  ;;  %v2228_v21 = vcombine.low %v288_v12, %v292_v13  ;;  %v2387_v22 = vld [vmem:[%s3483_s5 + $0x40] ss:$8 sps:$4 sm:$0xff]   ;;  %v2434_v12 = vld [vmem:[%s3483_s5 + $0x144] ss:$8 sps:$4 sm:$0xff]   ;;  %v2429_v13 = vld [vmem:[%s3483_s5 + $0x90] ss:$8 sps:$4 sm:$0xff]  }
 0x12c   :  { %1062 = vmatprep.subr.bf16.mxu1 %v2203_v24  ;;  %1081 = vmatprep.subr.bf16.mxu0 %v2165_v25  ;;  %v2221_v24 = vcombine.high %v280_v19, %v284_v20  ;;  %v2392_v25 = vld [vmem:[%s3483_s5 + $0x34] ss:$8 sps:$4 sm:$0xff]   ;;  %v2438_v19 = vld [vmem:[%s3483_s5 + $0x130] ss:$8 sps:$4 sm:$0xff]   ;;  %v2443_v20 = vld [vmem:[%s3483_s5 + $0x124] ss:$8 sps:$4 sm:$0xff]  }
 0x12e   :  { %1032 = vmatmul.mubr.bf16.vlgmr.msra.gmra.mxu0 %v2825_v63 }
 0x12f   :  { %1063 = vmatpush2.bf16.msra.mxu1 %v2202_v32  ;;  %1082 = vmatpush1.bf16.msra.mxu0 %v2164_v33  ;;  %v2213_v32 = vcombine.high %v272_v26, %v276_v27  ;;  %v2395_v33 = vld [vmem:[%s3483_s5 + $0x24] ss:$8 sps:$4 sm:$0xff]  }
 0x130   :  { %1113 = vmatprep.mubr.bf16.mxu0 %v2828_v0  ;;  %1064 = vmatprep.subr.bf16.mxu1 %v2195_v34  ;;  %v204_v0 = vld [vmem:[%s3481_s4 + $0x138] sm:$0xff] }
 0x131   :  { %1083 = vmatprep.subr.bf16.mxu0 %v2157_v36  ;;  %v2141_v31 = vcombine.high %v200_v45, %v204_v0  ;;  %v2140_v52 = vcombine.low %v200_v45, %v204_v0  ;;  %v264_v34 = vld [vmem:[%s3481_s4 + $0x318] sm:$0xff]  ;;  %v2212_v36 = vcombine.low %v272_v26, %v276_v27  ;;  %v2455_v26 = vld [vmem:[%s3483_s5 + $0x104] ss:$8 sps:$4 sm:$0xff]   ;;  %v2453_v27 = vld [vmem:[%s3483_s5 + $0x100] ss:$8 sps:$4 sm:$0xff]  }
 0x132   :  { %v2205_v38 = vcombine.high %v264_v34, %v268_v35  ;;  %v248_v45 = vld [vmem:[%s3481_s4 + $0x298] sm:$0xff] }
 0x133   :  { %1065 = vmatpush2.bf16.msra.mxu1 %v2194_v40  ;;  %1084 = vmatpush1.bf16.msra.mxu0 %v2156_v1  ;;  %v256_v40 = vld [vmem:[%s3481_s4 + $0x2d8] sm:$0xff] }
 0x134   :  { %1066 = vmatprep.subr.bf16.mxu1 %v2187_v41  ;;  %1085 = vmatprep.subr.bf16.mxu0 %v2149_v42  ;;  %v260_v1 = vld [vmem:[%s3481_s4 + $0x2f8] sm:$0xff]  ;;  %v2204_v41 = vcombine.low %v264_v34, %v268_v35 }
 0x135   :  { %v2396_v42 = vld [vmem:[%s3483_s5 + $0x10] ss:$8 sps:$4 sm:$0xff]   ;;  %v2197_v43 = vcombine.high %v256_v40, %v260_v1  ;;  %v2473_v34 = vld [vmem:[%s3483_s5 + $0x1d4] ss:$8 sps:$4 sm:$0xff]  }
 0x136   :  { %v252_v0 = vld [vmem:[%s3481_s4 + $0x2b8] sm:$0xff] }
 0x137   :  { %1067 = vmatpush2.bf16.msra.mxu1 %v2186_v46  ;;  %1086 = vmatpush1.bf16.msra.mxu0 %v2148_v29  ;;  %v2196_v46 = vcombine.low %v256_v40, %v260_v1  ;;  %v2399_v29 = vld [vmem:[%s3483_s5] ss:$8 sps:$4 sm:$0xff]   ;;  %v2188_v49 = vcombine.low %v248_v45, %v252_v0  ;;  %v2471_v35 = vld [vmem:[%s3483_s5 + $0x1d0] ss:$8 sps:$4 sm:$0xff]   ;;  %v2491_v40 = vld [vmem:[%s3483_s5 + $0x1a4] ss:$8 sps:$4 sm:$0xff]  }
 0x138   :  { %1068 = vmatprep.subr.bf16.mxu1 %v2179_v30  ;;  %1087 = vmatprep.subr.bf16.mxu0 %v2141_v31  ;;  %v2189_v30 = vcombine.high %v248_v45, %v252_v0  ;;  %v2404_v31 = vld [vmem:[%s3483_s5 + $0xf4] ss:$8 sps:$4 sm:$0xff]   ;;  %v2489_v1 = vld [vmem:[%s3483_s5 + $0x1a0] ss:$8 sps:$4 sm:$0xff]  }
 0x139   :  { %v2512_v45 = vld [vmem:[%s3483_s5 + $0x374] ss:$8 sps:$4 sm:$0xff]  }
 0x13b   :  { %1069 = vmatpush2.bf16.msra.mxu1 %v2178_v51  ;;  %1088 = vmatpush1.bf16.msra.mxu0 %v2140_v52  ;;  %v2181_v51 = vcombine.high %v240_v47, %v244_v48  ;;  %v2407_v52 = vld [vmem:[%s3483_s5 + $0xe4] ss:$8 sps:$4 sm:$0xff]  }
 0x13c   :  { %1070 = vmatprep.subr.bf16.mxu1 %v2171_v53  ;;  %1089 = vmatprep.subr.bf16.mxu0 %v2133_v54  ;;  %v232_v53 = vld [vmem:[%s3481_s4 + $0x218] sm:$0xff] }
 0x13d   :  { %v236_v54 = vld [vmem:[%s3481_s4 + $0x238] sm:$0xff] }
 0x13f   :  { %1071 = vmatpush2.bf16.msra.mxu1 %v2170_v57  ;;  %1090 = vmatpush1.bf16.msra.mxu0 %v2132_v58  ;;  %v2173_v57 = vcombine.high %v232_v53, %v236_v54  ;;  %v2410_v58 = vld [vmem:[%s3483_s5 + $0xd4] ss:$8 sps:$4 sm:$0xff]  }
 0x140   :  { %1091 = vmatprep.subr.bf16.mxu0 %v2125_v59  ;;  %1918 = vmatprep.subr.bf16.mxu1 %v2380_v60  ;;  %v2172_v59 = vcombine.low %v232_v53, %v236_v54  ;;  %v2408_v60 = vld [vmem:[%s3483_s5 + $0xd0] ss:$8 sps:$4 sm:$0xff]  }
 0x142   :  { %1073 = vmatmul.mubr.bf16.vlgmr.msra.gmra.mxu1 %v2825_v63 }
 0x143   :  { %1092 = vmatpush1.bf16.msra.mxu0 %v2124_v2  ;;  %1919 = vmatpush1.bf16.msra.mxu1 %v2378_v3  ;;  %v2411_v2 = vld [vmem:[%s3483_s5 + $0xc0] ss:$8 sps:$4 sm:$0xff]   ;;  %v2414_v3 = vld [vmem:[%s3483_s5 + $0x170] ss:$8 sps:$4 sm:$0xff]  }
 0x144   :  { %1093 = vmatprep.subr.bf16.mxu0 %v2117_v4  ;;  %1920 = vmatprep.subr.bf16.mxu1 %v2383_v5  ;;  %v2419_v4 = vld [vmem:[%s3483_s5 + $0xb4] ss:$8 sps:$4 sm:$0xff]   ;;  %v2422_v5 = vld [vmem:[%s3483_s5 + $0x164] ss:$8 sps:$4 sm:$0xff]  }
 0x147   :  { %1094 = vmatpush1.bf16.msra.mxu0 %v2116_v8  ;;  %1921 = vmatpush1.bf16.msra.mxu1 %v2381_v9  ;;  %v2425_v8 = vld [vmem:[%s3483_s5 + $0xa4] ss:$8 sps:$4 sm:$0xff]   ;;  %v2423_v9 = vld [vmem:[%s3483_s5 + $0xa0] ss:$8 sps:$4 sm:$0xff]  }
 0x148   :  { %1095 = vmatprep.subr.bf16.mxu0 %v2109_v10  ;;  %1922 = vmatprep.subr.bf16.mxu1 %v2386_v11  ;;  %v2426_v10 = vld [vmem:[%s3483_s5 + $0x150] ss:$8 sps:$4 sm:$0xff]   ;;  %v2431_v11 = vld [vmem:[%s3483_s5 + $0x94] ss:$8 sps:$4 sm:$0xff]  }
 0x14b   :  { %1096 = vmatpush1.bf16.msra.mxu0 %v2108_v14  ;;  %1923 = vmatpush1.bf16.msra.mxu1 %v2384_v15  ;;  %v2432_v14 = vld [vmem:[%s3483_s5 + $0x140] ss:$8 sps:$4 sm:$0xff]   ;;  %v2437_v15 = vld [vmem:[%s3483_s5 + $0x84] ss:$8 sps:$4 sm:$0xff]  }
 0x14c   :  { %1097 = vmatprep.subr.bf16.mxu0 %v2229_v17  ;;  %1924 = vmatprep.subr.bf16.mxu1 %v2389_v18  ;;  %v2440_v17 = vld [vmem:[%s3483_s5 + $0x134] ss:$8 sps:$4 sm:$0xff]   ;;  %v2435_v18 = vld [vmem:[%s3483_s5 + $0x80] ss:$8 sps:$4 sm:$0xff]  }
 0x14f   :  { %1098 = vmatpush2.bf16.msra.mxu0 %v2228_v21  ;;  %1925 = vmatpush1.bf16.msra.mxu1 %v2387_v22  ;;  %v2446_v21 = vld [vmem:[%s3483_s5 + $0x274] ss:$8 sps:$4 sm:$0xff]   ;;  %v2441_v22 = vld [vmem:[%s3483_s5 + $0x120] ss:$8 sps:$4 sm:$0xff]  }
 0x150   :  { %1099 = vmatprep.subr.bf16.mxu0 %v2221_v24  ;;  %1926 = vmatprep.subr.bf16.mxu1 %v2392_v25  ;;  %v2449_v24 = vld [vmem:[%s3483_s5 + $0x114] ss:$8 sps:$4 sm:$0xff]   ;;  %v2447_v25 = vld [vmem:[%s3483_s5 + $0x110] ss:$8 sps:$4 sm:$0xff]  }
 0x153   :  { %1100 = vmatpush2.bf16.msra.mxu0 %v2220_v28  ;;  %1927 = vmatpush1.bf16.msra.mxu1 %v2390_v23  ;;  %v2461_v28 = vld [vmem:[%s3483_s5 + $0x1f4] ss:$8 sps:$4 sm:$0xff]   ;;  %v2459_v23 = vld [vmem:[%s3483_s5 + $0x1f0] ss:$8 sps:$4 sm:$0xff]  }
 0x154   :  { %1101 = vmatprep.subr.bf16.mxu0 %v2213_v32  ;;  %1928 = vmatprep.subr.bf16.mxu1 %v2395_v33  ;;  %v2467_v32 = vld [vmem:[%s3483_s5 + $0x1e4] ss:$8 sps:$4 sm:$0xff]   ;;  %v2465_v33 = vld [vmem:[%s3483_s5 + $0x1e0] ss:$8 sps:$4 sm:$0xff]  }
 0x157   :  { %1102 = vmatpush2.bf16.msra.mxu0 %v2212_v36  ;;  %1929 = vmatpush1.bf16.msra.mxu1 %v2393_v37  ;;  %v2479_v36 = vld [vmem:[%s3483_s5 + $0x1c4] ss:$8 sps:$4 sm:$0xff]   ;;  %v2477_v37 = vld [vmem:[%s3483_s5 + $0x1c0] ss:$8 sps:$4 sm:$0xff]  }
 0x158   :  { %1103 = vmatprep.subr.bf16.mxu0 %v2205_v38  ;;  %1930 = vmatprep.subr.bf16.mxu1 %v2398_v39  ;;  %v2485_v38 = vld [vmem:[%s3483_s5 + $0x1b4] ss:$8 sps:$4 sm:$0xff]   ;;  %v2483_v39 = vld [vmem:[%s3483_s5 + $0x1b0] ss:$8 sps:$4 sm:$0xff]  }
 0x15b   :  { %1104 = vmatpush2.bf16.msra.mxu0 %v2204_v41  ;;  %1931 = vmatpush1.bf16.msra.mxu1 %v2396_v42  ;;  %v2497_v41 = vld [vmem:[%s3483_s5 + $0x194] ss:$8 sps:$4 sm:$0xff]   ;;  %v2495_v42 = vld [vmem:[%s3483_s5 + $0x190] ss:$8 sps:$4 sm:$0xff]  }
 0x15c   :  { %1105 = vmatprep.subr.bf16.mxu0 %v2197_v43  ;;  %1932 = vmatprep.subr.bf16.mxu1 %v2401_v44  ;;  %v2503_v43 = vld [vmem:[%s3483_s5 + $0x184] ss:$8 sps:$4 sm:$0xff]   ;;  %v2501_v44 = vld [vmem:[%s3483_s5 + $0x180] ss:$8 sps:$4 sm:$0xff]  }
 0x15f   :  { %1106 = vmatpush2.bf16.msra.mxu0 %v2196_v46  ;;  %1933 = vmatpush1.bf16.msra.mxu1 %v2399_v29 }
 0x160   :  { %1107 = vmatprep.subr.bf16.mxu0 %v2189_v30  ;;  %1934 = vmatprep.subr.bf16.mxu1 %v2404_v31  ;;  %v2098_v31 = vld [vmem:[%s3485_s3] ss:$0 sm:$0xff] }
 0x163   :  { %1108 = vmatpush2.bf16.msra.mxu0 %v2188_v49  ;;  %1935 = vmatpush2.bf16.msra.mxu1 %v2402_v50 }
 0x164   :  { %1109 = vmatprep.subr.bf16.mxu0 %v2181_v51  ;;  %1936 = vmatprep.subr.bf16.mxu1 %v2407_v52 }
 0x167   :  { %1110 = vmatpush2.bf16.msra.mxu0 %v2180_v55  ;;  %1937 = vmatpush2.bf16.msra.mxu1 %v2405_v56 }
 0x168   :  { %1111 = vmatprep.subr.bf16.mxu0 %v2173_v57  ;;  %1938 = vmatprep.subr.bf16.mxu1 %v2410_v58  ;;  %v2444_v57 = vld [vmem:[%s3483_s5 + $0x270] ss:$8 sps:$4 sm:$0xff]  }
 0x16b   :  { %1112 = vmatpush2.bf16.msra.mxu0 %v2172_v59  ;;  %1939 = vmatpush2.bf16.msra.mxu1 %v2408_v60  ;;  %v2452_v59 = vld [vmem:[%s3483_s5 + $0x264] ss:$8 sps:$4 sm:$0xff]   ;;  %v2450_v60 = vld [vmem:[%s3483_s5 + $0x260] ss:$8 sps:$4 sm:$0xff]  }
 0x16c   :  { %1940 = vmatprep.subr.bf16.mxu1 %v2413_v61  ;;  %1959 = vmatprep.subr.bf16.mxu0 %v2416_v62  ;;  %v2458_v61 = vld [vmem:[%s3483_s5 + $0x254] ss:$8 sps:$4 sm:$0xff]   ;;  %v2456_v62 = vld [vmem:[%s3483_s5 + $0x250] ss:$8 sps:$4 sm:$0xff]  }
 0x16e   :  { %1114 = vmatmul.mubr.bf16.vlgmr.msra.gmra.mxu0 %v2825_v63  ;;  %v2428_v63 = vld [vmem:[%s3483_s5 + $0x154] ss:$8 sps:$4 sm:$0xff]  }
 0x16f   :  { %1941 = vmatpush2.bf16.msra.mxu1 %v2411_v2  ;;  %1960 = vmatpush1.bf16.msra.mxu0 %v2414_v3  ;;  %v2464_v2 = vld [vmem:[%s3483_s5 + $0x244] ss:$8 sps:$4 sm:$0xff]   ;;  %v2462_v3 = vld [vmem:[%s3483_s5 + $0x240] ss:$8 sps:$4 sm:$0xff]  }
 0x170   :  { %1942 = vmatprep.subr.bf16.mxu1 %v2419_v4  ;;  %1961 = vmatprep.subr.bf16.mxu0 %v2422_v5  ;;  %v2470_v4 = vld [vmem:[%s3483_s5 + $0x234] ss:$8 sps:$4 sm:$0xff]   ;;  %v2468_v5 = vld [vmem:[%s3483_s5 + $0x230] ss:$8 sps:$4 sm:$0xff]  }
 0x173   :  { %1943 = vmatpush2.bf16.msra.mxu1 %v2417_v6  ;;  %1962 = vmatpush1.bf16.msra.mxu0 %v2420_v16  ;;  %v2476_v6 = vld [vmem:[%s3483_s5 + $0x224] ss:$8 sps:$4 sm:$0xff]   ;;  %v2474_v16 = vld [vmem:[%s3483_s5 + $0x220] ss:$8 sps:$4 sm:$0xff]  }
 0x174   :  { %1944 = vmatprep.subr.bf16.mxu1 %v2425_v8  ;;  %1963 = vmatprep.subr.bf16.mxu0 %v2428_v63  ;;  %v2482_v8 = vld [vmem:[%s3483_s5 + $0x214] ss:$8 sps:$4 sm:$0xff]   ;;  %v2480_v63 = vld [vmem:[%s3483_s5 + $0x210] ss:$8 sps:$4 sm:$0xff]  }
 0x177   :  { %1945 = vmatpush2.bf16.msra.mxu1 %v2423_v9  ;;  %1964 = vmatpush1.bf16.msra.mxu0 %v2426_v10  ;;  %v2488_v9 = vld [vmem:[%s3483_s5 + $0x204] ss:$8 sps:$4 sm:$0xff]   ;;  %v2486_v10 = vld [vmem:[%s3483_s5 + $0x200] ss:$8 sps:$4 sm:$0xff]  }
 0x178   :  { %1946 = vmatprep.subr.bf16.mxu1 %v2431_v11  ;;  %1965 = vmatprep.subr.bf16.mxu0 %v2434_v12  ;;  %v2494_v11 = vld [vmem:[%s3483_s5 + $0x2f4] ss:$8 sps:$4 sm:$0xff]   ;;  %v2492_v12 = vld [vmem:[%s3483_s5 + $0x2f0] ss:$8 sps:$4 sm:$0xff]  }
 0x17b   :  { %1947 = vmatpush2.bf16.msra.mxu1 %v2429_v13  ;;  %1966 = vmatpush1.bf16.msra.mxu0 %v2432_v14  ;;  %v2500_v13 = vld [vmem:[%s3483_s5 + $0x2e4] ss:$8 sps:$4 sm:$0xff]   ;;  %v2498_v14 = vld [vmem:[%s3483_s5 + $0x2e0] ss:$8 sps:$4 sm:$0xff]  }
 0x17c   :  { %1948 = vmatprep.subr.bf16.mxu1 %v2437_v15  ;;  %1967 = vmatprep.subr.bf16.mxu0 %v2440_v17  ;;  %v2506_v17 = vld [vmem:[%s3483_s5 + $0x2d4] ss:$8 sps:$4 sm:$0xff]  }
 0x17f   :  { %1949 = vmatpush2.bf16.msra.mxu1 %v2435_v18  ;;  %1968 = vmatpush1.bf16.msra.mxu0 %v2438_v19 }
 0x180   :  { %1969 = vmatprep.subr.bf16.mxu0 %v2443_v20  ;;  %2000 = vmatprep.subr.bf16.mxu1 %v2446_v21  ;;  %v2504_v21 = vld [vmem:[%s3483_s5 + $0x2d0] ss:$8 sps:$4 sm:$0xff]  }
 0x183   :  { %1970 = vmatpush1.bf16.msra.mxu0 %v2441_v22 }
 0x184   :  { %1971 = vmatprep.subr.bf16.mxu0 %v2449_v24 }
 0x187   :  { %1972 = vmatpush1.bf16.msra.mxu0 %v2447_v25  ;;  %v2509_v25 = vld [vmem:[%s3483_s5 + $0x2c4] ss:$8 sps:$4 sm:$0xff]  }
 0x188   :  { %1973 = vmatprep.subr.bf16.mxu0 %v2455_v26 }
 0x18b   :  { %1974 = vmatpush1.bf16.msra.mxu0 %v2453_v27 }
 0x18c   :  { %1975 = vmatprep.subr.bf16.mxu0 %v2461_v28 }
 0x18f   :  { %1976 = vmatpush2.bf16.msra.mxu0 %v2459_v23  ;;  %v2507_v23 = vld [vmem:[%s3483_s5 + $0x2c0] ss:$8 sps:$4 sm:$0xff]  }
 0x190   :  { %1977 = vmatprep.subr.bf16.mxu0 %v2467_v32  ;;  %v2510_v32 = vld [vmem:[%s3483_s5 + $0x370] ss:$8 sps:$4 sm:$0xff]  }
 0x193   :  { %1978 = vmatpush2.bf16.msra.mxu0 %v2465_v33 }
 0x194   :  { %1979 = vmatprep.subr.bf16.mxu0 %v2473_v34  ;;  %v2515_v34 = vld [vmem:[%s3483_s5 + $0x2b4] ss:$8 sps:$4 sm:$0xff]  }
 0x197   :  { %1980 = vmatpush2.bf16.msra.mxu0 %v2471_v35  ;;  %v2518_v35 = vld [vmem:[%s3483_s5 + $0x364] ss:$8 sps:$4 sm:$0xff]  }
 0x198   :  { %1981 = vmatprep.subr.bf16.mxu0 %v2479_v36  ;;  %v2513_v36 = vld [vmem:[%s3483_s5 + $0x2b0] ss:$8 sps:$4 sm:$0xff]  }
 0x19b   :  { %1982 = vmatpush2.bf16.msra.mxu0 %v2477_v37  ;;  %v2516_v37 = vld [vmem:[%s3483_s5 + $0x360] ss:$8 sps:$4 sm:$0xff]  }
 0x19c   :  { %1983 = vmatprep.subr.bf16.mxu0 %v2485_v38  ;;  %v2521_v38 = vld [vmem:[%s3483_s5 + $0x2a4] ss:$8 sps:$4 sm:$0xff]  }
 0x19f   :  { %1984 = vmatpush2.bf16.msra.mxu0 %v2483_v39  ;;  %v2524_v39 = vld [vmem:[%s3483_s5 + $0x354] ss:$8 sps:$4 sm:$0xff]  }
 0x1a0   :  { %1985 = vmatprep.subr.bf16.mxu0 %v2491_v40  ;;  %v2519_v40 = vld [vmem:[%s3483_s5 + $0x2a0] ss:$8 sps:$4 sm:$0xff]  }
 0x1a3   :  { %1986 = vmatpush2.bf16.msra.mxu0 %v2489_v1  ;;  %v2522_v1 = vld [vmem:[%s3483_s5 + $0x350] ss:$8 sps:$4 sm:$0xff]  }
 0x1a4   :  { %1987 = vmatprep.subr.bf16.mxu0 %v2497_v41  ;;  %v2527_v41 = vld [vmem:[%s3483_s5 + $0x294] ss:$8 sps:$4 sm:$0xff]  }
 0x1a7   :  { %1988 = vmatpush2.bf16.msra.mxu0 %v2495_v42  ;;  %v2530_v42 = vld [vmem:[%s3483_s5 + $0x344] ss:$8 sps:$4 sm:$0xff]  }
 0x1a8   :  { %1989 = vmatprep.subr.bf16.mxu0 %v2503_v43  ;;  %v2525_v43 = vld [vmem:[%s3483_s5 + $0x290] ss:$8 sps:$4 sm:$0xff]  }
 0x1ab   :  { %1990 = vmatpush2.bf16.msra.mxu0 %v2501_v44  ;;  %v2528_v44 = vld [vmem:[%s3483_s5 + $0x340] ss:$8 sps:$4 sm:$0xff]  }
 0x1ac   :  { %2041 = vmatprep.subr.bf16.mxu0 %v2512_v45 }
 0x1ae   :  { %v111_v0 = vpop.f32.mrf.mxu0 }
 0x1af   :  { %v3276_v47 = vadd.f32 %v2098_v31, %v111_v0  ;;  %v2533_v0 = vld [vmem:[%s3483_s5 + $0x284] ss:$8 sps:$4 sm:$0xff]  }
 0x1b0   :  { %v2368_v46 = vpop.f32.mrf.mxu0 }
 0x1b1   :  { %v2536_v46 = vld [vmem:[%s3483_s5 + $0x334] ss:$8 sps:$4 sm:$0xff]  }
 0x1b2   :  { %v114_v29 = vpop.f32.mrf.mxu0 }
 0x1b4   :  { %v2369_v30 = vpop.f32.mrf.mxu0 }
 0x1c2   :  { %v992_v48 = vpop.f32.mrf.mxu1 }
 0x1c3   :  { %v993_v49 = vadd.f32 %v992_v48, %v3276_v47  ;;  %v2531_v48 = vld [vmem:[%s3483_s5 + $0x280] ss:$8 sps:$4 sm:$0xff]  }
 0x1c4   :  { %v994_v50 = vpop.f32.mrf.mxu1 }
 0x1c5   :  { %v995_v51 = vadd.f32 %v994_v50, %v3276_v47  ;;  %v1122_v52 = vmax.f32 %v993_v49, 0.0  ;;  %v2534_v49 = vld [vmem:[%s3483_s5 + $0x330] ss:$8 sps:$4 sm:$0xff]  }
 0x1c6   :  { %v996_v53 = vpop.f32.mrf.mxu1 }
 0x1c7   :  { %v1123_v54 = vmax.f32 %v995_v51, 0.0  ;;  %v1130_v58 = vpack.c.bf16 %v1122_v52, %v1122_v52  ;;  %v2539_v52 = vld [vmem:[%s3483_s5 + $0x324] ss:$8 sps:$4 sm:$0xff]  }
 0x1c8   :  { %v997_v55 = vpop.f32.mrf.mxu1 }
 0x1c9   :  { %v1131_v56 = vpack.c.bf16 %v1123_v54, %v1123_v54 }
 0x1cb   :  { %1950 = vmatprep.mubr.bf16.mxu1 %v1131_v56  ;;  %v2537_v56 = vld [vmem:[%s3483_s5 + $0x320] ss:$8 sps:$4 sm:$0xff]  }
 0x1cc   :  { %1951 = vmatmul.mubr.bf16.vlgmr.msra.gmra.mxu1 %v1130_v58  ;;  %v2542_v58 = vld [vmem:[%s3483_s5 + $0x314] ss:$8 sps:$4 sm:$0xff]  }
 0x1cd   :  { %2001 = vmatpush1.bf16.msra.mxu1 %v2444_v57 }
 0x1ce   :  { %2002 = vmatprep.subr.bf16.mxu1 %v2452_v59  ;;  %v2540_v59 = vld [vmem:[%s3483_s5 + $0x310] ss:$8 sps:$4 sm:$0xff]  }
 0x1d1   :  { %2003 = vmatpush1.bf16.msra.mxu1 %v2450_v60  ;;  %v2545_v60 = vld [vmem:[%s3483_s5 + $0x304] ss:$8 sps:$4 sm:$0xff]  }
 0x1d2   :  { %2004 = vmatprep.subr.bf16.mxu1 %v2458_v61  ;;  %v2543_v61 = vld [vmem:[%s3483_s5 + $0x300] ss:$8 sps:$4 sm:$0xff]  }
 0x1d5   :  { %2005 = vmatpush1.bf16.msra.mxu1 %v2456_v62  ;;  %v2548_v62 = vld [vmem:[%s3483_s5 + $0x3f4] ss:$8 sps:$4 sm:$0xff]  }
 0x1d6   :  { %2006 = vmatprep.subr.bf16.mxu1 %v2464_v2  ;;  %v2546_v2 = vld [vmem:[%s3483_s5 + $0x3f0] ss:$8 sps:$4 sm:$0xff]  }
 0x1d9   :  { %2007 = vmatpush1.bf16.msra.mxu1 %v2462_v3  ;;  %v2551_v3 = vld [vmem:[%s3483_s5 + $0x3e4] ss:$8 sps:$4 sm:$0xff]  }
 0x1da   :  { %2008 = vmatprep.subr.bf16.mxu1 %v2470_v4  ;;  %v2549_v4 = vld [vmem:[%s3483_s5 + $0x3e0] ss:$8 sps:$4 sm:$0xff]  }
 0x1dd   :  { %2009 = vmatpush1.bf16.msra.mxu1 %v2468_v5  ;;  %v2554_v5 = vld [vmem:[%s3483_s5 + $0x3d4] ss:$8 sps:$4 sm:$0xff]  }
 0x1de   :  { %2010 = vmatprep.subr.bf16.mxu1 %v2476_v6  ;;  %v2552_v6 = vld [vmem:[%s3483_s5 + $0x3d0] ss:$8 sps:$4 sm:$0xff]  }
 0x1e1   :  { %2011 = vmatpush1.bf16.msra.mxu1 %v2474_v16  ;;  %v2557_v16 = vld [vmem:[%s3483_s5 + $0x3c4] ss:$8 sps:$4 sm:$0xff]  }
 0x1e2   :  { %2012 = vmatprep.subr.bf16.mxu1 %v2482_v8  ;;  %v2555_v8 = vld [vmem:[%s3483_s5 + $0x3c0] ss:$8 sps:$4 sm:$0xff]  }
 0x1e5   :  { %2013 = vmatpush1.bf16.msra.mxu1 %v2480_v63  ;;  %v2560_v63 = vld [vmem:[%s3483_s5 + $0x3b4] ss:$8 sps:$4 sm:$0xff]  }
 0x1e6   :  { %2014 = vmatprep.subr.bf16.mxu1 %v2488_v9  ;;  %v2558_v9 = vld [vmem:[%s3483_s5 + $0x3b0] ss:$8 sps:$4 sm:$0xff]  }
 0x1e9   :  { %2015 = vmatpush1.bf16.msra.mxu1 %v2486_v10  ;;  %v2563_v10 = vld [vmem:[%s3483_s5 + $0x3a4] ss:$8 sps:$4 sm:$0xff]  }
 0x1ea   :  { %2016 = vmatprep.subr.bf16.mxu1 %v2494_v11  ;;  %v2561_v11 = vld [vmem:[%s3483_s5 + $0x3a0] ss:$8 sps:$4 sm:$0xff]  }
 0x1ed   :  { %2017 = vmatpush2.bf16.msra.mxu1 %v2492_v12  ;;  %v2566_v12 = vld [vmem:[%s3483_s5 + $0x394] ss:$8 sps:$4 sm:$0xff]  }
 0x1ee   :  { %v1033_v15 = vpop.f32.mrf.mxu0  ;;  %2018 = vmatprep.subr.bf16.mxu1 %v2500_v13  ;;  %v2564_v13 = vld [vmem:[%s3483_s5 + $0x390] ss:$8 sps:$4 sm:$0xff]  }
 0x1ef   :  { %v1034_v18 = vadd.f32 %v1033_v15, %v3276_v47  ;;  %v2569_v15 = vld [vmem:[%s3483_s5 + $0x384] ss:$8 sps:$4 sm:$0xff]  }
 0x1f0   :  { %v1035_v19 = vpop.f32.mrf.mxu0 }
 0x1f1   :  { %v1036_v20 = vadd.f32 %v1035_v19, %v3276_v47  ;;  %2019 = vmatpush2.bf16.msra.mxu1 %v2498_v14  ;;  %v1124_v22 = vmax.f32 %v1034_v18, 0.0 }
 0x1f2   :  { %v1037_v24 = vpop.f32.mrf.mxu0  ;;  %2020 = vmatprep.subr.bf16.mxu1 %v2506_v17 }
 0x1f3   :  { %v1125_v26 = vmax.f32 %v1036_v20, 0.0  ;;  %v1132_v33 = vpack.c.bf16 %v1124_v22, %v1124_v22  ;;  %v2567_v20 = vld [vmem:[%s3483_s5 + $0x380] ss:$8 sps:$4 sm:$0xff]  }
 0x1f4   :  { %v1038_v27 = vpop.f32.mrf.mxu0 }
 0x1f5   :  { %v1133_v28 = vpack.c.bf16 %v1125_v26, %v1125_v26  ;;  %2021 = vmatpush2.bf16.msra.mxu1 %v2504_v21 }
 0x1f6   :  { %2022 = vmatprep.subr.bf16.mxu1 %v2509_v25 }
 0x1f7   :  { %1991 = vmatprep.mubr.bf16.mxu0 %v1133_v28 }
 0x1f8   :  { %1992 = vmatmul.mubr.bf16.vlgmr.msra.gmra.mxu0 %v1132_v33 }
 0x1f9   :  { %2023 = vmatpush2.bf16.msra.mxu1 %v2507_v23  ;;  %2042 = vmatpush1.bf16.msra.mxu0 %v2510_v32 }
 0x1fa   :  { %2024 = vmatprep.subr.bf16.mxu1 %v2515_v34  ;;  %2043 = vmatprep.subr.bf16.mxu0 %v2518_v35 }
 0x1fd   :  { %2025 = vmatpush2.bf16.msra.mxu1 %v2513_v36  ;;  %2044 = vmatpush1.bf16.msra.mxu0 %v2516_v37 }
 0x1fe   :  { %2026 = vmatprep.subr.bf16.mxu1 %v2521_v38  ;;  %2045 = vmatprep.subr.bf16.mxu0 %v2524_v39 }
 0x201   :  { %2027 = vmatpush2.bf16.msra.mxu1 %v2519_v40  ;;  %2046 = vmatpush1.bf16.msra.mxu0 %v2522_v1  ;;  %v1270_v1 = vsub.s32 0, %v2629_v7 }
 0x202   :  { %v1074_v45 = vpop.f32.mrf.mxu1  ;;  %2028 = vmatprep.subr.bf16.mxu1 %v2527_v41  ;;  %2047 = vmatprep.subr.bf16.mxu0 %v2530_v42  ;;  %v1274_v41 = vsub.s32 1, %v2629_v7  ;;  %v1266_v42 = vld [vmem:[%s3486_s6] sm:$0x3] }
 0x203   :  { %v1075_v29 = vadd.f32 %v1074_v45, %v3276_v47 }
 0x204   :  { %v1076_v30 = vpop.f32.mrf.mxu1 }
 0x205   :  { %v1077_v31 = vadd.f32 %v1076_v30, %v3276_v47  ;;  %2029 = vmatpush2.bf16.msra.mxu1 %v2525_v43  ;;  %2048 = vmatpush1.bf16.msra.mxu0 %v2528_v44  ;;  %v1126_v50 = vmax.f32 %v1075_v29, 0.0  ;;  %v1271_v43 = vrot.slane %v1266_v42, %v1270_v1  ;;  %v1275_v44 = vrot.slane %v1266_v42, %v1274_v41 }
 0x206   :  { %v1078_v51 = vpop.f32.mrf.mxu1  ;;  %2030 = vmatprep.subr.bf16.mxu1 %v2533_v0  ;;  %2049 = vmatprep.subr.bf16.mxu0 %v2536_v46 }
 0x207   :  { %v1127_v53 = vmax.f32 %v1077_v31, 0.0  ;;  %v1134_v57 = vpack.c.bf16 %v1126_v50, %v1126_v50 }
 0x208   :  { %v1079_v54 = vpop.f32.mrf.mxu1 }
 0x209   :  { %v1135_v55 = vpack.c.bf16 %v1127_v53, %v1127_v53  ;;  %2031 = vmatpush2.bf16.msra.mxu1 %v2531_v48  ;;  %2050 = vmatpush1.bf16.msra.mxu0 %v2534_v49 }
 0x20a   :  { %2051 = vmatprep.subr.bf16.mxu0 %v2539_v52 }
 0x20b   :  { %2032 = vmatprep.mubr.bf16.mxu1 %v1135_v55 }
 0x20c   :  { %2033 = vmatmul.mubr.bf16.vlgmr.msra.gmra.mxu1 %v1134_v57 }
 0x20d   :  { %2052 = vmatpush1.bf16.msra.mxu0 %v2537_v56 }
 0x20e   :  { %2053 = vmatprep.subr.bf16.mxu0 %v2542_v58 }
 0x211   :  { %2054 = vmatpush1.bf16.msra.mxu0 %v2540_v59 }
 0x212   :  { %2055 = vmatprep.subr.bf16.mxu0 %v2545_v60 }
 0x215   :  { %2056 = vmatpush1.bf16.msra.mxu0 %v2543_v61 }
 0x216   :  { %2057 = vmatprep.subr.bf16.mxu0 %v2548_v62 }
 0x219   :  { %2058 = vmatpush2.bf16.msra.mxu0 %v2546_v2 }
 0x21a   :  { %2059 = vmatprep.subr.bf16.mxu0 %v2551_v3 }
 0x21d   :  { %2060 = vmatpush2.bf16.msra.mxu0 %v2549_v4 }
 0x21e   :  { %2061 = vmatprep.subr.bf16.mxu0 %v2554_v5 }
 0x221   :  { %2062 = vmatpush2.bf16.msra.mxu0 %v2552_v6 }
 0x222   :  { %2063 = vmatprep.subr.bf16.mxu0 %v2557_v16 }
 0x225   :  { %2064 = vmatpush2.bf16.msra.mxu0 %v2555_v8 }
 0x226   :  { %2065 = vmatprep.subr.bf16.mxu0 %v2560_v63 }
 0x229   :  { %2066 = vmatpush2.bf16.msra.mxu0 %v2558_v9 }
 0x22a   :  { %2067 = vmatprep.subr.bf16.mxu0 %v2563_v10 }
 0x22d   :  { %2068 = vmatpush2.bf16.msra.mxu0 %v2561_v11 }
 0x22e   :  { %v1115_v14 = vpop.f32.mrf.mxu0  ;;  %2069 = vmatprep.subr.bf16.mxu0 %v2566_v12 }
 0x22f   :  { %v1116_v17 = vadd.f32 %v1115_v14, %v3276_v47 }
 0x230   :  { %v1117_v18 = vpop.f32.mrf.mxu0 }
 0x231   :  { %v1118_v19 = vadd.f32 %v1117_v18, %v3276_v47  ;;  %2070 = vmatpush2.bf16.msra.mxu0 %v2564_v13  ;;  %v1128_v21 = vmax.f32 %v1116_v17, 0.0 }
 0x232   :  { %v1119_v22 = vpop.f32.mrf.mxu0  ;;  %2071 = vmatprep.subr.bf16.mxu0 %v2569_v15 }
 0x233   :  { %v1129_v24 = vmax.f32 %v1118_v19, 0.0  ;;  %v1136_v27 = vpack.c.bf16 %v1128_v21, %v1128_v21 }
 0x234   :  { %v1120_v25 = vpop.f32.mrf.mxu0 }
 0x235   :  { %v1137_v26 = vpack.c.bf16 %v1129_v24, %v1129_v24  ;;  %2072 = vmatpush2.bf16.msra.mxu0 %v2567_v20 }
 0x237   :  { %2073 = vmatprep.mubr.bf16.mxu0 %v1137_v26 }
 0x238   :  { %2074 = vmatmul.mubr.bf16.vlgmr.msra.gmra.mxu0 %v1136_v27 }
 0x28c   :  { %v1952_v28 = vpop.f32.mrf.mxu1 }
 0x28d   :  { %v1953_v45 = vadd.f32 %v1952_v28, %v1271_v43 }
 0x28e   :  { %v1954_v23 = vpop.f32.mrf.mxu1 }
 0x28f   :  { %v1955_v0 = vadd.f32 %v1954_v23, %v1275_v44 }
 0x290   :  { %v1956_v32 = vpop.f32.mrf.mxu1 }
 0x292   :  { %v1957_v33 = vpop.f32.mrf.mxu1 }
 0x2b8   :  { %v1993_v47 = vpop.f32.mrf.mxu0 }
 0x2b9   :  { %v1994_v46 = vadd.f32 %v1993_v47, %v1953_v45 }
 0x2ba   :  { %v1995_v34 = vpop.f32.mrf.mxu0 }
 0x2bb   :  { %v1996_v29 = vadd.f32 %v1995_v34, %v1955_v0 }
 0x2bc   :  { %v1997_v35 = vpop.f32.mrf.mxu0 }
 0x2be   :  { %v1998_v36 = vpop.f32.mrf.mxu0 }
 0x2cc   :  { %v2034_v37 = vpop.f32.mrf.mxu1 }
 0x2cd   :  { %v2035_v31 = vadd.f32 %v2034_v37, %v1994_v46 }
 0x2ce   :  { %v2036_v38 = vpop.f32.mrf.mxu1 }
 0x2cf   :  { %v2037_v48 = vadd.f32 %v2036_v38, %v1996_v29 }
 0x2d0   :  { %v2038_v39 = vpop.f32.mrf.mxu1 }
 0x2d2   :  { %v2039_v40 = vpop.f32.mrf.mxu1 }
 0x2f8   :  { %v2075_v30 = vpop.f32.mrf.mxu0 }
 0x2f9   :  { %v2076_v50 = vadd.f32 %v2075_v30, %v2035_v31 }
 0x2fa   :  { %v2077_v49 = vpop.f32.mrf.mxu0 }
 0x2fb   :  { %v2078_v51 = vadd.f32 %v2077_v49, %v2037_v48 }
 0x2fc   :  { %v2079_v52 = vpop.f32.mrf.mxu0 }
 0x2fd   :  { %v2084_v53 = vcombine.low %v2076_v50, %v2078_v51 }
 0x2fe   :  { %v2080_v54 = vpop.f32.mrf.mxu0 }
 0x2ff   :  { %2358 = vst.sshfl [vmem:[%s3487_s7] sm:$0x33 pattern:$0x76325410] %v2084_v53 }

</bundles_post_ra>
